<compile_context>
chip_gen: v5e
topology: v5e:2x2
jax: 0.10.0
libtpu: 0.0.40
codegen_flags: <defaults>
</compile_context>

<pallas_src>
import functools

import jax
import jax.numpy as jnp
from jax.experimental import pallas as pl
from jax.experimental.pallas import tpu as pltpu


def _round_up(n, m):
    return ((n + m - 1) // m) * m


def _cdiv(a, b):
    return -(-a // b)


def _choose_batch_tiling(B, tile_batch):
    """Pick (TB, B_pad): TB multiple of 8, prefer an even tile count (v7x megacore)."""
    B8 = _round_up(B, 8)
    TB = min(_round_up(tile_batch, 8), B8)
    n = _cdiv(B8, TB)
    if n % 2 == 1 and B8 >= 16:
        TB = _round_up(_cdiv(B8, n + 1), 8)
        n = _cdiv(B8, TB)
    return TB, n * TB


def pad_policy_params(w1, b1, w2, b2):
    """One-time lane-dense padding of the params (call once; reuse across forwards).

    Hidden/action dims are zero-padded to multiples of 128 (exact for this net).
    b2's padded lanes are filled with -1e30: since the padded w2 columns are zero,
    padded logits equal -1e30 exactly and softmax gives them zero probability —
    no in-kernel mask is needed.
    """
    S, H = w1.shape
    A = w2.shape[1]
    H_pad = _round_up(H, 128)
    A_pad = _round_up(A, 128)
    w1_p = jnp.pad(w1, ((0, 0), (0, H_pad - H)))
    b1_p = jnp.pad(b1, ((0, 0), (0, H_pad - H)))
    w2_p = jnp.pad(w2, ((0, H_pad - H), (0, A_pad - A)))
    b2_p = jnp.pad(b2, ((0, 0), (0, A_pad - A)), constant_values=-1e30)
    return w1_p, b1_p, w2_p, b2_p


def policy_net_kernel(x_ref, w1_ref, b1_ref, w2_ref, b2_ref, out_ref, *, num_actions):
    # fc1 + ReLU (MXU, f32 accumulation). Hidden dim is lane-dense (padded to 128k).
    h = jnp.dot(x_ref[...], w1_ref[...], preferred_element_type=jnp.float32)
    h = jnp.maximum(h + b1_ref[...], 0.0)  # b1 is [1, H_pad] -> broadcasts over batch

    # fc2: padded hidden rows of w2 are zero, padded b2 lanes are -1e30 -> padded
    # logits are exactly -1e30 and exp() underflows them to 0 (no mask needed).
    logits = jnp.dot(h, w2_ref[...], preferred_element_type=jnp.float32) + b2_ref[...]

    # Numerically stable softmax over the (lane-dense padded) action axis.
    m = jnp.max(logits, axis=-1, keepdims=True)
    e = jnp.exp(logits - m)
    denom = jnp.sum(e, axis=-1, keepdims=True)
    probs = e * pl.reciprocal(denom, approx=False)

    # Store only the real actions (out block is (TB, A)) -> minimal output writeback.
    out_ref[...] = probs[:, :num_actions].astype(out_ref.dtype)


def policy_net_forward(x, w1_p, b1_p, w2_p, b2_p, *, num_actions, tile_batch=1024):
    """Fused PolicyNet forward: softmax(relu(x @ w1 + b1) @ w2 + b2, axis=1).

    Expects params already padded by `pad_policy_params`; `num_actions` is the true
    (unpadded) action dimension.
    """
    B, S = x.shape
    H_pad = w1_p.shape[1]
    A_pad = w2_p.shape[1]
    A = num_actions

    TB, B_pad = _choose_batch_tiling(B, tile_batch)
    if B_pad != B:
        x = jnp.pad(x, ((0, B_pad - B), (0, 0)))

    kernel = functools.partial(policy_net_kernel, num_actions=A)
    vmem_resident = pl.BlockSpec(memory_space=pltpu.MemorySpace.VMEM)

    out = pl.pallas_call(
        kernel,
        out_shape=jax.ShapeDtypeStruct((B_pad, A), jnp.float32),
        grid_spec=pltpu.PrefetchScalarGridSpec(
            num_scalar_prefetch=0,
            grid=(B_pad // TB,),
            in_specs=[
                pl.BlockSpec((TB, S), lambda i: (i, 0)),  # batch-tiled, pipelined input
                vmem_resident,  # w1  [S, H_pad]     -- single-buffered resident
                vmem_resident,  # b1  [1, H_pad]
                vmem_resident,  # w2  [H_pad, A_pad]
                vmem_resident,  # b2  [1, A_pad]
            ],
            out_specs=pl.BlockSpec((TB, A), lambda i: (i, 0)),  # true-width output
        ),
        compiler_params=pltpu.CompilerParams(
            dimension_semantics=("parallel",),  # shard batch tiles across TCs on v7x
        ),
    )(x, w1_p, b1_p, w2_p, b2_p)

    return out if B_pad == B else out[:B]


def init_params(key, state_dim, hidden_dim, action_dim):
    # Deterministic init mimicking PyTorch Linear's uniform(-1/sqrt(fan_in), 1/sqrt(fan_in)).
    k1, k2, k3, k4 = jax.random.split(key, 4)
    lim1 = 1.0 / jnp.sqrt(state_dim)
    lim2 = 1.0 / jnp.sqrt(hidden_dim)
    w1 = jax.random.uniform(k1, (state_dim, hidden_dim), jnp.float32, -lim1, lim1)
    b1 = jax.random.uniform(k2, (1, hidden_dim), jnp.float32, -lim1, lim1)
    w2 = jax.random.uniform(k3, (hidden_dim, action_dim), jnp.float32, -lim2, lim2)
    b2 = jax.random.uniform(k4, (1, action_dim), jnp.float32, -lim2, lim2)
    return w1, b1, w2, b2


if __name__ == "__main__":
    # Small shapes consistent with the module (CartPole-style PPO policy net).
    # batch=16 with the default tiling gives a 2-step batch-tiled grid.
    batch, state_dim, hidden_dim, action_dim = 16, 4, 32, 2

    key = jax.random.PRNGKey(0)
    kx, kp = jax.random.split(key)
    x = jax.random.normal(kx, (batch, state_dim), jnp.float32)
    w1, b1, w2, b2 = init_params(kp, state_dim, hidden_dim, action_dim)

    # Pad params once (outside the per-call forward).
    w1_p, b1_p, w2_p, b2_p = pad_policy_params(w1, b1, w2, b2)

    probs = policy_net_forward(x, w1_p, b1_p, w2_p, b2_p, num_actions=action_dim)
    probs = jax.block_until_ready(probs)

    # Reference check in plain JAX (same math as the PyTorch forward).
    h_ref = jnp.maximum(x @ w1 + b1, 0.0)
    ref = jax.nn.softmax(h_ref @ w2 + b2, axis=1)
    assert probs.shape == (batch, action_dim)
    assert jnp.allclose(probs, ref, atol=1e-5, rtol=1e-5)
    assert jnp.allclose(jnp.sum(probs, axis=1), 1.0, atol=1e-5)

    print("KERNEL_OK")
</pallas_src>

<mosaic_0001>
module attributes {stable_mosaic.version = 11 : i64} {
  func.func @policy_net_kernel(%arg0: i32, %arg1: memref<8x4xf32, #tpu.memory_space<vmem>>, %arg2: memref<4x128xf32, #tpu.memory_space<vmem>>, %arg3: memref<1x128xf32, #tpu.memory_space<vmem>>, %arg4: memref<128x128xf32, #tpu.memory_space<vmem>>, %arg5: memref<1x128xf32, #tpu.memory_space<vmem>>, %arg6: memref<8x2xf32, #tpu.memory_space<vmem>>) attributes {dimension_semantics = [#tpu.dimension_semantics<parallel>], iteration_bounds = array<i64: 2>, scalar_prefetch = 0 : i64, scratch_operands = 0 : i64, tpu.core_type = #tpu.core_type<tc>, window_params = [{transform_indices = @transform_0, window_bounds = array<i64: 8, 4>}, {pipeline_mode = #tpu.pipeline_mode<synchronous>, transform_indices = @transform_1, window_bounds = array<i64: 4, 128>}, {pipeline_mode = #tpu.pipeline_mode<synchronous>, transform_indices = @transform_2, window_bounds = array<i64: 1, 128>}, {pipeline_mode = #tpu.pipeline_mode<synchronous>, transform_indices = @transform_3, window_bounds = array<i64: 128, 128>}, {pipeline_mode = #tpu.pipeline_mode<synchronous>, transform_indices = @transform_4, window_bounds = array<i64: 1, 128>}, {transform_indices = @transform_5, window_bounds = array<i64: 8, 2>}]} {
    %c0 = arith.constant 0 : index
    %c0_0 = arith.constant 0 : index
    %0 = vector.load %arg1[%c0, %c0_0] : memref<8x4xf32, #tpu.memory_space<vmem>>, vector<8x4xf32>
    %c0_1 = arith.constant 0 : index
    %c0_2 = arith.constant 0 : index
    %1 = vector.load %arg2[%c0_1, %c0_2] : memref<4x128xf32, #tpu.memory_space<vmem>>, vector<4x128xf32>
    %cst = arith.constant dense<0.000000e+00> : vector<8x128xf32>
    %2 = tpu.matmul %0, %1, %cst {dimension_numbers = #tpu.dot_dimension_numbers<[1], [0], [0], [1], [0, 0, 1, 1], [], []>} : vector<8x4xf32>, vector<4x128xf32>, vector<8x128xf32> -> vector<8x128xf32>
    %c0_3 = arith.constant 0 : index
    %c0_4 = arith.constant 0 : index
    %3 = vector.load %arg3[%c0_3, %c0_4] : memref<1x128xf32, #tpu.memory_space<vmem>>, vector<1x128xf32>
    %4 = vector.broadcast %3 : vector<1x128xf32> to vector<8x128xf32>
    %5 = arith.addf %2, %4 : vector<8x128xf32>
    %cst_5 = arith.constant 0.000000e+00 : f32
    %6 = vector.broadcast %cst_5 : f32 to vector<8x128xf32>
    %7 = arith.maximumf %5, %6 : vector<8x128xf32>
    %c0_6 = arith.constant 0 : index
    %c0_7 = arith.constant 0 : index
    %8 = vector.load %arg4[%c0_6, %c0_7] : memref<128x128xf32, #tpu.memory_space<vmem>>, vector<128x128xf32>
    %cst_8 = arith.constant dense<0.000000e+00> : vector<8x128xf32>
    %9 = tpu.matmul %7, %8, %cst_8 {dimension_numbers = #tpu.dot_dimension_numbers<[1], [0], [0], [1], [0, 0, 1, 1], [], []>} : vector<8x128xf32>, vector<128x128xf32>, vector<8x128xf32> -> vector<8x128xf32>
    %c0_9 = arith.constant 0 : index
    %c0_10 = arith.constant 0 : index
    %10 = vector.load %arg5[%c0_9, %c0_10] : memref<1x128xf32, #tpu.memory_space<vmem>>, vector<1x128xf32>
    %11 = vector.broadcast %10 : vector<1x128xf32> to vector<8x128xf32>
    %12 = arith.addf %9, %11 : vector<8x128xf32>
    %cst_11 = arith.constant dense<0xFF800000> : vector<8xf32>
    %13 = vector.multi_reduction <maximumf>, %12, %cst_11 [1] : vector<8x128xf32> to vector<8xf32>
    %14 = vector.shape_cast %13 : vector<8xf32> to vector<8x1xf32>
    %15 = vector.broadcast %14 : vector<8x1xf32> to vector<8x128xf32>
    %16 = arith.subf %12, %15 : vector<8x128xf32>
    %17 = math.exp %16 : vector<8x128xf32>
    %cst_12 = arith.constant dense<0.000000e+00> : vector<8xf32>
    %18 = vector.multi_reduction <add>, %17, %cst_12 [1] : vector<8x128xf32> to vector<8xf32>
    %19 = vector.shape_cast %18 : vector<8xf32> to vector<8x1xf32>
    %20 = tpu.reciprocal %19 : vector<8x1xf32> -> vector<8x1xf32>
    %21 = vector.broadcast %20 : vector<8x1xf32> to vector<8x128xf32>
    %22 = arith.mulf %17, %21 : vector<8x128xf32>
    %23 = vector.extract_strided_slice %22 {offsets = [0, 0], sizes = [8, 2], strides = [1, 1]} : vector<8x128xf32> to vector<8x2xf32>
    %c0_13 = arith.constant 0 : index
    %c0_14 = arith.constant 0 : index
    %24 = vector.load %arg6[%c0_13, %c0_14] : memref<8x2xf32, #tpu.memory_space<vmem>>, vector<8x2xf32>
    tpu.vector_store %arg6[%c0_13, %c0_14], %23 {strides = array<i32>} : memref<8x2xf32, #tpu.memory_space<vmem>>, vector<8x2xf32>,
    return
  }
  func.func @transform_0(%arg0: i32) -> (i32, i32) {
    %c0_i32 = arith.constant 0 : i32
    %c0_i32_0 = arith.constant 0 : i32
    return %arg0, %c0_i32 : i32, i32
  }
  func.func @transform_1(%arg0: i32) -> (i32, i32) {
    %c0_i32 = arith.constant 0 : i32
    %c0_i32_0 = arith.constant 0 : i32
    %c0_i32_1 = arith.constant 0 : i32
    return %c0_i32, %c0_i32_0 : i32, i32
  }
  func.func @transform_2(%arg0: i32) -> (i32, i32) {
    %c0_i32 = arith.constant 0 : i32
    %c0_i32_0 = arith.constant 0 : i32
    %c0_i32_1 = arith.constant 0 : i32
    return %c0_i32, %c0_i32_0 : i32, i32
  }
  func.func @transform_3(%arg0: i32) -> (i32, i32) {
    %c0_i32 = arith.constant 0 : i32
    %c0_i32_0 = arith.constant 0 : i32
    %c0_i32_1 = arith.constant 0 : i32
    return %c0_i32, %c0_i32_0 : i32, i32
  }
  func.func @transform_4(%arg0: i32) -> (i32, i32) {
    %c0_i32 = arith.constant 0 : i32
    %c0_i32_0 = arith.constant 0 : i32
    %c0_i32_1 = arith.constant 0 : i32
    return %c0_i32, %c0_i32_0 : i32, i32
  }
  func.func @transform_5(%arg0: i32) -> (i32, i32) {
    %c0_i32 = arith.constant 0 : i32
    %c0_i32_0 = arith.constant 0 : i32
    return %arg0, %c0_i32 : i32, i32
  }
}

</mosaic_0001>

<bundles_post_ra>
// kernel: tpu_custom_call.1
= control target key start
LH: loop header
LB: loop body
LE: loop exit
PB: predicated region body
PF: predicated region fallthrough
CT: control target
= control target key end

     0   :  { %10 = vsyncpa [#allocation3], 0  ;;  %s516_s18 = smov 0   ;;  %s552_s0 = inlined_call_operand.vmem [shape: f32[16,4], index: 0, kind: input, shape index: {}]   ;;  %s553_s1 = inlined_call_operand.vmem [shape: f32[4,128], index: 1, kind: input, shape index: {}]   ;;  %s554_s2 = inlined_call_operand.vmem [shape: f32[1,128], index: 2, kind: input, shape index: {}]   ;;  %s555_s3 = inlined_call_operand.hbm [shape: f32[128,128], index: 3, kind: input, shape index: {}]   ;;  %s556_s4 = inlined_call_operand.vmem [shape: f32[1,128], index: 4, kind: input, shape index: {}]   ;;  %s557_s5 = inlined_call_operand.vmem [shape: f32[16,2], index: 5, kind: output, shape index: {}]  }
   0x1 LB: > { %s174_s21 = sshll.u32 %s555_s3, 4  ;;  %s401_s22 = sadd.s32 4294967295, %s481_s18   ;;  %s481_s18 = sphi %s516_s18, %s16_s18   ;;  %s175_s21 = int_to_ptr.hbm [resolvable:$true] %s174_s21 }
   0x2   : > { %p403_p0 = scmp.ge.s32.totalorder %s481_s18, 1  ;;  %p157_p1 = scmp.lt.s32.totalorder %s481_s18, 3 }
   0x3   : > { %p422_p2 = scmp.eq.s32.totalorder %s401_s22, 0  ;;  %s483_s23 = smov [#allocation2]  }
   0x4   : > { %p158_p3 = pnand %p403_p0, %p157_p1  ;;  %s176_s24 = sshll.u32 %s483_s23, 4  ;;  %s177_s24 = int_to_ptr.vmem [resolvable:$true] %s176_s24 }
   0x5   : > { %s484_s25 = smov 128   ;;  %s485_s26 = smov 8  }
   0x6   : > { %p418_p4 = pneg %p158_p3  ;;  %202 = sbr.rel (%p158_p3) target bundleno = 539 (0x21b), region = 40 }
   0x8   : > { %p419_p5 = pnand %p422_p2, %p418_p4 }
   0xa   : > { %421 = dma.hbm_to_vmem [thread:$0]  (!%p419_p5), %s175_s21, 2048, %s177_s24, [#allocation3], %s484_s25, %s484_s25, %s485_s26  }
   0xb   : > { %476 = dma.done.wait (%p422_p2), [#allocation3], 2048  }
   0xc   : > { %478 = vsyncadd (%p422_p2), [#allocation3], 4294965248  ;;  %p229_p6 = scmp.lt.s32.totalorder %s401_s22, 1  ;;  %vm247_vm0 = vcmask 1043456   ;;  %vm243_vm1 = vcmask 31744   ;;  %v287_v2 = vld [vmem:[#allocation2 + $0x78] sm:$0xff] }
   0xd   : > { %v238_v0 = vld [vmem:[%s553_s1] sm:$0xf]  ;;  %292 = vmatpush.msra.mxu1 %v287_v2  ;;  %v286_v3 = vld [vmem:[#allocation2 + $0x70] sm:$0xff]  ;;  %v285_v4 = vld [vmem:[#allocation2 + $0x68] sm:$0xff]  ;;  %vm334_vm6 = vcmask 15360  }
   0xe   : > { %s559_s22 = smov (!%p229_p6, %s401_s22), 1  ;;  %410 = vmatpush.msk.msra.mxu0 %vm247_vm0, %v238_v0  ;;  %v284_v5 = vld [vmem:[#allocation2 + $0x60] sm:$0xff]  ;;  %v283_v6 = vld [vmem:[#allocation2 + $0x58] sm:$0xff]  ;;  %v282_v7 = vld [vmem:[#allocation2 + $0x50] sm:$0xff] }
   0xf   : > { %s408_s27 = sshll.u32 %s559_s22, 3  ;;  %293 = vmatpush.msra.mxu1 %v286_v3  ;;  %v281_v8 = vld [vmem:[#allocation2 + $0x48] sm:$0xff]  ;;  %v280_v9 = vld [vmem:[#allocation2 + $0x40] sm:$0xff]  ;;  %v279_v10 = vld [vmem:[#allocation2 + $0x38] sm:$0xff] }
  0x10   : > { %s232_s30 = scalar_lea.vmem %s552_s0, %s408_s27  ;;  %v278_v11 = vld [vmem:[#allocation2 + $0x30] sm:$0xff]  ;;  %v277_v12 = vld [vmem:[#allocation2 + $0x28] sm:$0xff]  ;;  %v276_v13 = vld [vmem:[#allocation2 + $0x20] sm:$0xff]  ;;  %s236_s14 = scalar_lea.vmem %s557_s5, %s408_s27 }
  0x11   : > { %v237_v1 = vld [vmem:[%s232_s30] sm:$0xff]  ;;  %294 = vmatpush.msra.mxu1 %v285_v4  ;;  %v275_v14 = vld [vmem:[#allocation2 + $0x18] sm:$0xff]  ;;  %v274_v15 = vld [vmem:[#allocation2 + $0x10] sm:$0xff] }
  0x12   : > { %411 = vmatmul.msk.f32.vlgmr.msra.gmra.mxu0 %vm243_vm1, %v237_v1  ;;  %v273_v16 = vld [vmem:[#allocation2 + $0x8] sm:$0xff]  ;;  %v272_v17 = vld [vmem:[#allocation2] sm:$0xff] }
  0x13   : > { %295 = vmatpush.msra.mxu1 %v284_v5  ;;  %v435_v18 = vld [vmem:[%s554_s2] ss:$0 sm:$0xff] }
  0x14   : > { %v436_v22 = vld [vmem:[%s556_s4] ss:$0 sm:$0xff] }
  0x15   : > { %296 = vmatpush.msra.mxu1 %v283_v6 }
  0x17   : > { %297 = vmatpush.msra.mxu1 %v282_v7 }
  0x19   : > { %298 = vmatpush.msra.mxu1 %v281_v8 }
  0x1b   : > { %299 = vmatpush.msra.mxu1 %v280_v9 }
  0x1d   : > { %300 = vmatpush.msra.mxu1 %v279_v10 }
  0x1f   : > { %301 = vmatpush.msra.mxu1 %v278_v11 }
  0x21   : > { %302 = vmatpush.msra.mxu1 %v277_v12 }
  0x23   : > { %303 = vmatpush.msra.mxu1 %v276_v13 }
  0x25   : > { %304 = vmatpush.msra.mxu1 %v275_v14 }
  0x27   : > { %305 = vmatpush.msra.mxu1 %v274_v15 }
  0x29   : > { %306 = vmatpush.msra.mxu1 %v273_v16 }
  0x2b   : > { %307 = vmatpush.msra.mxu1 %v272_v17 }
  0x8f   : > { %v268_v19 = vpop.f32.mrf.mxu0 }
  0x90   : > { %v269_v20 = vadd.f32 %v435_v18, %v268_v19 }
  0x92   : > { %v271_v21 = vmax.f32 %v269_v20, 0.0 }
  0x94   : > { %308 = vmatmul.f32.vlgmr.msra.gmra.mxu1 %v271_v21 }
 0x111   : > { %v309_v23 = vpop.f32.mrf.mxu1 }
 0x112   : > { %v310_v24 = vadd.f32 %v436_v22, %v309_v23 }
 0x114   : > { %312 = vmax.xlane.f32.xlu0 %v310_v24 }
 0x187   : > { %v313_v25 = vpop.xlane.xlu0 %312 }
 0x188   : > { %v314_v26 = vsub.f32 %v310_v24, %v313_v25 }
 0x18a   : > { %v315_v27 = vmul.f32 1.442695, %v314_v26 }
 0x18c   : > { %437 = vpow2.f32 %v315_v27 }
 0x192   : > { %v438_v28 = vpop.eup %437 }
 0x193   : > { %317 = vadd.xlane.f32.xlu0 %v438_v28 }
 0x206   : > { %v318_v29 = vpop.xlane.xlu0 %317 }
 0x207   : > { %439 = vrcp.f32 %v318_v29  ;;  %v330_v33 = vand.u32 2147483648, %v318_v29  ;;  %v328_v35 = vand.u32 2147483647, %v318_v29  ;;  %vm324_vm3 = vweird.f32 %v318_v29 }
 0x209   : > { %v331_v37 = vor.u32 1.1754944e-38, %v330_v33  ;;  %vm329_vm5 = vcmp.eq.f32.partialorder %v328_v35, 8.507059e+37 }
 0x20d   : > { %v440_v30 = vpop.eup %439 }
 0x20e   : > { %v320_v31 = vmul.f32 %v440_v30, %v318_v29  ;;  %vm325_vm2 = vweird.f32 %v440_v30 }
 0x20f   : > { %vm326_vm4 = vmor %vm324_vm3, %vm325_vm2 }
 0x210   : > { %v321_v32 = vsub.f32 1.0, %v320_v31 }
 0x212   : > { %v322_v34 = vmul.f32 %v440_v30, %v321_v32 }
 0x214   : > { %v323_v36 = vadd.f32 %v440_v30, %v322_v34 }
 0x216   : > { %v327_v38 = vsel %vm326_vm4, %v440_v30, %v323_v36 }
 0x217   : > { %v332_v39 = vsel %vm329_vm5, %v331_v37, %v327_v38 }
 0x218   : > { %v333_v40 = vmul.f32 %v438_v28, %v332_v39 }
 0x21a   : > { %335 = vst.msk [vmem:[%s236_s14] sm:$0xff] %vm334_vm6, %v333_v40 }
 0x21b PF: > { %s16_s18 = sadd.s32 1, %s481_s18  }
 0x21c   : > { %p13_p7 = scmp.ge.s32.totalorder %s16_s18, 4  }
 0x21e   :  { %15 = sbr.rel (!%p13_p7) target bundleno = 1 (0x1), region = 75 }
 0x223   :  { %355 = vsyncpa [#allocation3], 1 }
 0x224   :  { %357 = vsyncpa [#allocation3 + $0x1], 1 }

</bundles_post_ra>
